<compile_context>
chip_gen: v7x
topology: tpu7x:2x2x1
jax: 0.10.0
libtpu: 0.0.40
codegen_flags: <defaults>
</compile_context>

<pallas_src>
import jax
import jax.numpy as jnp
from jax.experimental import pallas as pl
from jax.experimental.pallas import tpu as pltpu


def _round_up(n: int, m: int) -> int:
    return ((n + m - 1) // m) * m


def _round_down(n: int, m: int) -> int:
    return (n // m) * m


# Budget (bytes) for the double-buffered f32 x stream in VMEM.
_X_STREAM_BUDGET = 12 * 1024 * 1024


def _choose_tiles(B: int, F: int, max_tb: int):
    assert max_tb % 128 == 0 and max_tb >= 128, "max_tb must be a multiple of 128"
    # Feature tile: keep F whole unless it is very wide; then pick a
    # multiple-of-128 *divisor* so the contraction tiles exactly (a ragged F
    # block would feed unspecified values into the reduction).
    tf = F
    if F > 2048:
        for cand in (2048, 1024, 512, 256, 128):
            if F % cand == 0:
                tf = cand
                break
    # Batch tile from the VMEM budget for the double-buffered x stream.
    tb = _round_down(_X_STREAM_BUDGET // (2 * 4 * max(tf, 1)), 128)
    tb = max(128, min(tb, max_tb))
    # Give v7x's two TensorCores >= 2 grid steps to split the parallel axis
    # (costs one ~0.35us extra step on single-TC chips — negligible).
    tb = min(tb, max(128, _round_up(pl.cdiv(B, 2), 128)))
    # Never exceed the (128-rounded) batch itself.
    tb = min(tb, _round_up(B, 128))
    return tb, tf


def linear_kernel(x_ref, w_ref, b_ref, o_ref):
    # x_ref: (TB, TF) VMEM batch tile of the input
    # w_ref: (1, TF)  VMEM weight slice (constant along the batch grid axis)
    # b_ref: (1,)     SMEM scalar bias
    # o_ref: (1, TB)  lane-dense output row, resident across the F grid axis
    @pl.when(pl.program_id(1) == 0)
    def _init():
        o_ref[...] = jnp.full(o_ref.shape, b_ref[0], dtype=o_ref.dtype)

    # MXU contraction over F: (1, TF) x (TB, TF) -> (1, TB). Both operands
    # contract their last dim (attention's q·k^T pattern), so the lane-dense
    # output row is produced directly with no post-hoc relayout.
    o_ref[...] += jax.lax.dot_general(
        w_ref[...], x_ref[...],
        dimension_numbers=(((1,), (1,)), ((), ())),
        preferred_element_type=jnp.float32,
    ).astype(o_ref.dtype)


def pallas_linear(x, w, b, *, max_tb: int = 8192):
    """Linear(n_features -> 1).

    x: (B, F) f32
    w: (1, F) f32  (torch.nn.Linear weight layout: (out_features=1, in_features))
    b: (1,)   f32
    returns: (B, 1) f32  ==  x @ w.T + b
    """
    B, F = x.shape
    assert w.shape == (1, F) and b.shape == (1,)

    tb, tf = _choose_tiles(B, F, max_tb)
    grid_b = pl.cdiv(B, tb)
    grid_f = pl.cdiv(F, tf)
    bp = grid_b * tb  # lane-dense padded output width; columns >= B sliced off

    out = pl.pallas_call(
        linear_kernel,
        out_shape=jax.ShapeDtypeStruct((1, bp), jnp.float32),
        grid=(grid_b, grid_f),
        in_specs=[
            # x streams from HBM; last batch block may be ragged (no jnp.pad).
            pl.BlockSpec((tb, tf), lambda i, k: (i, k)),
            # Weight slice: constant batch index -> stays resident, no re-DMA.
            pl.BlockSpec((1, tf), lambda i, k: (0, k)),
            # Bias: whole (1,) array in SMEM, read as a scalar.
            pl.BlockSpec(memory_space=pltpu.MemorySpace.SMEM),
        ],
        # Lane-dense output row (batch on the 128-lane axis), resident over k.
        out_specs=pl.BlockSpec((1, tb), lambda i, k: (0, i)),
        compiler_params=pltpu.CompilerParams(
            dimension_semantics=("parallel", "arbitrary"),
            vmem_limit_bytes=32 * 1024 * 1024,
        ),
    )(x, w, b)

    # Layout plumbing back to torch.nn.Linear's (B, 1) output shape.
    return out[0, :B].reshape(B, 1).astype(x.dtype)


if __name__ == "__main__":
    key = jax.random.PRNGKey(0)
    batch, n_features = 8, 32
    kx, kw, kb, kx2 = jax.random.split(key, 4)

    x = jax.random.normal(kx, (batch, n_features), dtype=jnp.float32)

    # 1) Exact module semantics: torch.nn.init.constant_(weight, 0) / (bias, 0).
    w0 = jnp.zeros((1, n_features), dtype=jnp.float32)
    b0 = jnp.zeros((1,), dtype=jnp.float32)
    y0 = pallas_linear(x, w0, b0)
    jax.block_until_ready(y0)
    assert y0.shape == (batch, 1)
    assert jnp.allclose(y0, jnp.zeros((batch, 1), jnp.float32), atol=1e-6)

    # 2) Random params so the allclose check exercises the MXU path.
    w = jax.random.normal(kw, (1, n_features), dtype=jnp.float32)
    b = jax.random.normal(kb, (1,), dtype=jnp.float32)
    y = pallas_linear(x, w, b)
    jax.block_until_ready(y)
    y_ref = x @ w.T + b
    assert y.shape == (batch, 1)
    assert jnp.allclose(y, y_ref, atol=1e-5, rtol=1e-5), "mismatch vs reference"

    # 3) Multi-tile batch grid with a ragged last block (no x padding pass).
    big_b = 520  # not a multiple of the tile -> exercises the ragged tail
    x_big = jax.random.normal(kx2, (big_b, n_features), dtype=jnp.float32)
    y_big = pallas_linear(x_big, w, b, max_tb=128)  # grid_b = cdiv(520,128) = 5
    jax.block_until_ready(y_big)
    y_big_ref = x_big @ w.T + b
    assert y_big.shape == (big_b, 1)
    assert jnp.allclose(y_big, y_big_ref, atol=1e-5, rtol=1e-5), "tiled mismatch"

    print("KERNEL_OK")
</pallas_src>

<mosaic_0001>
module attributes {stable_mosaic.version = 11 : i64} {
  func.func @linear_kernel(%arg0: i32, %arg1: i32, %arg2: memref<128x32xf32, #tpu.memory_space<vmem>>, %arg3: memref<1x32xf32, #tpu.memory_space<vmem>>, %arg4: memref<1xf32, #tpu.memory_space<smem>>, %arg5: memref<1x128xf32, #tpu.memory_space<vmem>>) attributes {dimension_semantics = [#tpu.dimension_semantics<parallel>, #tpu.dimension_semantics<arbitrary>], iteration_bounds = array<i64: 1, 1>, scalar_prefetch = 0 : i64, scratch_operands = 0 : i64, tpu.core_type = #tpu.core_type<tc>, window_params = [{transform_indices = @transform_0, window_bounds = array<i64: 128, 32>}, {transform_indices = @transform_1, window_bounds = array<i64: 1, 32>}, {transform_indices = @transform_2, window_bounds = array<i64: 1>}, {transform_indices = @transform_3, window_bounds = array<i64: 1, 128>}]} {
    %c0_i32 = arith.constant 0 : i32
    %0 = arith.cmpi eq, %arg1, %c0_i32 : i32
    %1 = arith.extui %0 : i1 to i32
    %c0_i32_0 = arith.constant 0 : i32
    %2 = arith.cmpi ne, %1, %c0_i32_0 : i32
    scf.if %2 {
      %c0_8 = arith.constant 0 : index
      %9 = memref.load %arg4[%c0_8] : memref<1xf32, #tpu.memory_space<smem>>
      %10 = vector.broadcast %9 : f32 to vector<1x128xf32>
      %c0_9 = arith.constant 0 : index
      %c0_10 = arith.constant 0 : index
      %11 = vector.load %arg5[%c0_9, %c0_10] : memref<1x128xf32, #tpu.memory_space<vmem>>, vector<1x128xf32>
      tpu.vector_store %arg5[%c0_9, %c0_10], %10 {strides = array<i32>} : memref<1x128xf32, #tpu.memory_space<vmem>>, vector<1x128xf32>,
    } else {
    }
    %c0 = arith.constant 0 : index
    %c0_1 = arith.constant 0 : index
    %3 = vector.load %arg5[%c0, %c0_1] : memref<1x128xf32, #tpu.memory_space<vmem>>, vector<1x128xf32>
    %c0_2 = arith.constant 0 : index
    %c0_3 = arith.constant 0 : index
    %4 = vector.load %arg3[%c0_2, %c0_3] : memref<1x32xf32, #tpu.memory_space<vmem>>, vector<1x32xf32>
    %c0_4 = arith.constant 0 : index
    %c0_5 = arith.constant 0 : index
    %5 = vector.load %arg2[%c0_4, %c0_5] : memref<128x32xf32, #tpu.memory_space<vmem>>, vector<128x32xf32>
    %cst = arith.constant dense<0.000000e+00> : vector<1x128xf32>
    %6 = tpu.matmul %4, %5, %cst {dimension_numbers = #tpu.dot_dimension_numbers<[1], [1], [0], [0], [0, 0, 1, 0], [], []>} : vector<1x32xf32>, vector<128x32xf32>, vector<1x128xf32> -> vector<1x128xf32>
    %7 = arith.addf %3, %6 : vector<1x128xf32>
    %c0_6 = arith.constant 0 : index
    %c0_7 = arith.constant 0 : index
    %8 = vector.load %arg5[%c0_6, %c0_7] : memref<1x128xf32, #tpu.memory_space<vmem>>, vector<1x128xf32>
    tpu.vector_store %arg5[%c0_6, %c0_7], %7 {strides = array<i32>} : memref<1x128xf32, #tpu.memory_space<vmem>>, vector<1x128xf32>,
    return
  }
  func.func @transform_0(%arg0: i32, %arg1: i32) -> (i32, i32) {
    %c0_i32 = arith.constant 0 : i32
    return %arg0, %arg1 : i32, i32
  }
  func.func @transform_1(%arg0: i32, %arg1: i32) -> (i32, i32) {
    %c0_i32 = arith.constant 0 : i32
    %c0_i32_0 = arith.constant 0 : i32
    return %c0_i32, %arg1 : i32, i32
  }
  func.func @transform_2(%arg0: i32, %arg1: i32) -> i32 {
    %c0_i32 = arith.constant 0 : i32
    %c0_i32_0 = arith.constant 0 : i32
    return %c0_i32 : i32
  }
  func.func @transform_3(%arg0: i32, %arg1: i32) -> (i32, i32) {
    %c0_i32 = arith.constant 0 : i32
    %c0_i32_0 = arith.constant 0 : i32
    return %c0_i32, %arg0 : i32, i32
  }
}

</mosaic_0001>

<bundles_post_ra>
// kernel: tpu_custom_call.1
= control target key start
LH: loop header
LB: loop body
LE: loop exit
PB: predicated region body
PF: predicated region fallthrough
CT: control target
= control target key end

     0   :  { %9 = vsyncpa [#allocation4], 0  ;;  %s430_s0 = inlined_call_operand.hbm [shape: f32[8,32], index: 0, kind: input, shape index: {}]   ;;  %s431_s1 = inlined_call_operand.vmem [shape: f32[1,32], index: 1, kind: input, shape index: {}]   ;;  %s432_s2 = inlined_call_operand.<no memory space> [shape: f32[1], index: 2, kind: input, shape index: {}]   ;;  %s433_s3 = inlined_call_operand.hbm [shape: f32[1,128], index: 3, kind: output, shape index: {}]  }
   0x1   :  { %10 = vsyncpa [#allocation5], 0 }
   0x2   :  { %15 = vsyncadd [#allocation4], 1920  ;;  %s350_s12 = smov [#allocation3]   ;;  %s302_s16 = scalar_lea.hbm %s430_s0, 128 }
   0x3   :  { %s16_s13 = sshll.u32 %s350_s12, 4  ;;  %p303_p0 = scmp.ne.s32.totalorder %s430_s0, %s302_s16  ;;  %s17_s13 = int_to_ptr.vmem [resolvable:$true] %s16_s13 }
   0x4   :  { %p306_p1 = scmp.lt.u32.totalorder %s302_s16, %s430_s0 }
   0x6   :  { %p308_p2 = pnand %p306_p1, %p303_p0 }
   0x8   :  { %311 = shalt.err (!%p308_p2)
}
   0x9   :  { %s312_s21 = scalar_lea.vmem %s17_s13, 128  ;;  %s316_s22 = scalar_lea.vmem %s17_s13, 2048 }
   0xa   :  { %p313_p3 = scmp.ne.s32.totalorder %s17_s13, %s312_s21  ;;  %p317_p4 = scmp.lt.s32.totalorder %s17_s13, %s17_s13 }
   0xb   :  { %p318_p5 = scmp.lt.s32.totalorder %s316_s22, %s312_s21 }
   0xd   :  { %p319_p6 = por %p318_p5, %p317_p4 }
   0xf   :  { %p320_p7 = pnand %p319_p6, %p313_p3 }
  0x11   :  { %323 = shalt.err (!%p320_p7)
}
  0x12   :  { %s351_s23 = smov 128   ;;  %s352_s24 = smov 8  }
  0x13   :  { %22 = dma.hbm_to_vmem [thread:$0]  %s430_s0, 128, %s17_s13, [#allocation4], %s351_s23, %s351_s23, %s352_s24  }
  0x14   :  { %346 = dma.done.wait [#allocation4], 2048  }
  0x15   :  { %347 = vsyncadd [#allocation4], 4294965248  ;;  %v353_v0 = vmov 0.0|0.0   ;;  %vm354_vm0 = vmmov 0   ;;  %v355_v1 = vmov 0.0   ;;  %v35_v2 = vstv %s432_s2  ;;  %v39_v3 = vld [vmem:[#allocation3] sm:$0xff] }
  0x16   :  { %263 = vmatprep.subr.bf16.mxu0 %v353_v0  ;;  %260 = vmatprep.mubr.msk.f32.mxu0 %vm354_vm0, %v355_v1  ;;  %36 = vst [vmem:[#allocation6] sm:$0x1] %v35_v2  ;;  %vm55_vm1 = vcmask 261120   ;;  %v40_v4 = vld [vmem:[#allocation3 + $0x8] sm:$0xff]  ;;  %v41_v7 = vld [vmem:[#allocation3 + $0x10] sm:$0xff]  ;;  %v42_v8 = vld [vmem:[#allocation3 + $0x18] sm:$0xff] }
  0x17   :  { %vm394_vm2 = vmpackc.low %vm55_vm1, %vm55_vm1  ;;  %v264_v6 = vpack.c.bf16 %v40_v4, %v39_v3  ;;  %v268_v9 = vpack.c.bf16 %v42_v8, %v41_v7  ;;  %v43_v10 = vld [vmem:[#allocation3 + $0x20] sm:$0xff]  ;;  %v44_v11 = vld [vmem:[#allocation3 + $0x28] sm:$0xff]  ;;  %s356_s29 = smov [#allocation6]  }
  0x18   :  { %v272_v12 = vpack.c.bf16 %v44_v11, %v43_v10  ;;  %v45_v13 = vld [vmem:[#allocation3 + $0x30] sm:$0xff]  ;;  %v46_v14 = vld [vmem:[#allocation3 + $0x38] sm:$0xff]  ;;  %v47_v16 = vld [vmem:[#allocation3 + $0x40] sm:$0xff]  ;;  %s185_s30 = sshll.u32 %s356_s29, 4  ;;  %s186_s30 = int_to_ptr.vmem [resolvable:$true] %s185_s30 }
  0x19   :  { %266 = vmatpush3.bf16.xpose.msk.msra.mxu0 %vm394_vm2, %v264_v6  ;;  %v276_v15 = vpack.c.bf16 %v46_v14, %v45_v13  ;;  %v48_v17 = vld [vmem:[#allocation3 + $0x48] sm:$0xff]  ;;  %v49_v19 = vld [vmem:[#allocation3 + $0x50] sm:$0xff]  ;;  %v50_v20 = vld [vmem:[#allocation3 + $0x58] sm:$0xff]  ;;  %s324_s4 = scalar_lea.vmem %s186_s30, 16  ;;  %s328_s5 = scalar_lea.vmem %s186_s30, 32 }
  0x1a   :  { %267 = vmatprep.subr.bf16.mxu0 %v353_v0  ;;  %v280_v18 = vpack.c.bf16 %v48_v17, %v47_v16  ;;  %v284_v21 = vpack.c.bf16 %v50_v20, %v49_v19  ;;  %v51_v22 = vld [vmem:[#allocation3 + $0x60] sm:$0xff]  ;;  %v52_v23 = vld [vmem:[#allocation3 + $0x68] sm:$0xff]  ;;  %v53_v25 = vld [vmem:[#allocation3 + $0x70] sm:$0xff]  ;;  %p325_p8 = scmp.ne.s32.totalorder %s186_s30, %s324_s4  ;;  %p329_p9 = scmp.lt.s32.totalorder %s186_s30, %s186_s30 }
  0x1b   :  { %v288_v24 = vpack.c.bf16 %v52_v23, %v51_v22  ;;  %v54_v26 = vld [vmem:[#allocation3 + $0x78] sm:$0xff]  ;;  %v38_v28 = vld [vmem:[%s431_s1] sm:$0x1]  ;;  %p330_p10 = scmp.lt.s32.totalorder %s328_s5, %s324_s4 }
  0x1c   :  { %v292_v27 = vpack.c.bf16 %v54_v26, %v53_v25 }
  0x1d   :  { %v37_v29 = vld [vmem:[#allocation6] sm:$0x1]  ;;  %p331_p11 = por %p330_p10, %p329_p9 }
  0x1f   :  { %p332_p12 = pnand %p331_p11, %p325_p8 }
  0x21   :  { %270 = vmatpush3.bf16.xpose.msk.msra.mxu0 %vm394_vm2, %v268_v9 }
  0x22   :  { %271 = vmatprep.subr.bf16.mxu0 %v353_v0 }
  0x29   :  { %274 = vmatpush3.bf16.xpose.msk.msra.mxu0 %vm394_vm2, %v272_v12 }
  0x2a   :  { %275 = vmatprep.subr.bf16.mxu0 %v353_v0 }
  0x31   :  { %278 = vmatpush3.bf16.xpose.msk.msra.mxu0 %vm394_vm2, %v276_v15 }
  0x32   :  { %279 = vmatprep.subr.bf16.mxu0 %v353_v0 }
  0x39   :  { %282 = vmatpush3.bf16.xpose.msk.msra.mxu0 %vm394_vm2, %v280_v18 }
  0x3a   :  { %283 = vmatprep.subr.bf16.mxu0 %v353_v0 }
  0x41   :  { %286 = vmatpush3.bf16.xpose.msk.msra.mxu0 %vm394_vm2, %v284_v21 }
  0x42   :  { %287 = vmatprep.subr.bf16.mxu0 %v353_v0 }
  0x49   :  { %290 = vmatpush3.bf16.xpose.msk.msra.mxu0 %vm394_vm2, %v288_v24 }
  0x4a   :  { %291 = vmatprep.subr.bf16.mxu0 %v353_v0 }
  0x51   :  { %294 = vmatpush3.bf16.xpose.msk.msra.mxu0 %vm394_vm2, %v292_v27 }
  0x58   :  { %261 = vmatmul.mubr.msk.f32.vlgmr.msra.gmra.mrb[0].mxu0 %vm55_vm1, %v38_v28 }
 0x12b   :  { %v173_v30 = vpop.f32.mrb[0].mxu0 }
 0x12c   :  { %v177_v31 = vadd.f32 %v173_v30, %v37_v29  ;;  %v262_v32 = vpop.f32.mrb[1].mxu0 }
 0x12e   :  { %178 = vst [vmem:[#allocation6] sm:$0x1] %v177_v31 }
 0x12f   :  { %335 = shalt.err (!%p332_p12)
}
 0x130   :  { %s336_s7 = scalar_lea.hbm %s433_s3, 16 }
 0x131   :  { %p337_p13 = scmp.ne.s32.totalorder %s433_s3, %s336_s7  ;;  %p340_p0 = scmp.lt.u32.totalorder %s336_s7, %s433_s3 }
 0x133   :  { %p342_p1 = pnand %p340_p0, %p337_p13 }
 0x135   :  { %345 = shalt.err (!%p342_p1)
}
 0x136   :  { %188 = dma.vmem_to_hbm [thread:$0]  %s186_s30, 16, %s433_s3, [#allocation5]  }
 0x137   :  { %348 = dma.done.wait [#allocation5], 16  }
 0x138   :  { %349 = vsyncadd [#allocation5], 4294967280 }
 0x139   :  { %192 = vsyncpa [#allocation4], 1 }
 0x13a   :  { %193 = vsyncpa [#allocation5], 1 }

</bundles_post_ra>
